<compile_context>
chip_gen: v5e
topology: v5e:2x2
jax: 0.10.0
libtpu: 0.0.40
codegen_flags: <defaults>
</compile_context>

<pallas_src>
import functools

import jax
import jax.numpy as jnp
from jax import lax
from jax.experimental import pallas as pl
from jax.experimental.pallas import tpu as pltpu

_LANE = 128
_SUBLANE = 8
_MIN_SPLIT_BYTES = 2 * 1024 * 1024   # split a single block for megacore only if >= this


def _round_up(x, m):
    return (x + m - 1) // m * m


def _ceil_div(a, b):
    return -(-a // b)


@functools.lru_cache(maxsize=None)
def _gen_params():
    """Per-generation (per-input block byte budget, scoped VMEM limit)."""
    try:
        vmem = pltpu.get_tpu_info().vmem_capacity_bytes
    except Exception:
        vmem = 64 * 1024 * 1024                      # conservative (v7x-safe) default
    if vmem >= 100 * 1024 * 1024:                    # v5e / v6e: 128 MiB physical VMEM
        return 8 * 1024 * 1024, 64 * 1024 * 1024
    return 6 * 1024 * 1024, 48 * 1024 * 1024         # v7x: 64 MiB physical VMEM


def _choose_blocks(rows, cols, itemsize, target_block_bytes):
    """Pick (block_rows, block_cols) filling ~target_block_bytes per input,
    accounting for (8, 128) layout padding of each block."""
    pr = _round_up(rows, _SUBLANE)       # sublane-padded rows
    pc = _round_up(cols, _LANE)          # lane-padded cols

    # (a) Whole array fits in a single block.
    if pr * pc * itemsize <= target_block_bytes:
        return rows, cols

    # (b) Short rows: keep all rows, grow block_cols to fill the budget
    #     (multiple of 128, no 2048-lane cap).
    if pr * _LANE * itemsize <= target_block_bytes:
        block_cols = (target_block_bytes // (pr * itemsize)) // _LANE * _LANE
        return rows, block_cols

    # (c) Tall: keep full width, grow block_rows (multiple of 8).
    if pc * _SUBLANE * itemsize <= target_block_bytes:
        block_rows = (target_block_bytes // (pc * itemsize)) // _SUBLANE * _SUBLANE
        return block_rows, cols

    # (d) Both huge: tile both axes.
    block_cols = max(_LANE,
                     (target_block_bytes // (_SUBLANE * itemsize)) // _LANE * _LANE)
    return _SUBLANE, block_cols


# ----------------------------- Pallas kernel -------------------------------
def _sse_partial_kernel(p_ref, t_ref, out_ref, *, block_rows, block_cols,
                        rows, cols, mask_rows, mask_cols):
    """Write sum((pred - target)^2) of this block to its own output partial."""
    # Inputs stream in native dtype; cast to f32 on the VPU inside the kernel.
    d = p_ref[...].astype(jnp.float32) - t_ref[...].astype(jnp.float32)
    sq = d * d

    if not (mask_rows or mask_cols):
        out_ref[...] = jnp.full((1, 1, 1), jnp.sum(sq), dtype=jnp.float32)
        return

    i = pl.program_id(0)
    j = pl.program_id(1)
    conds = []
    if mask_rows:
        conds.append(i == pl.num_programs(0) - 1)
    if mask_cols:
        conds.append(j == pl.num_programs(1) - 1)
    boundary = conds[0] if len(conds) == 1 else jnp.logical_or(conds[0], conds[1])

    # Masking only on boundary tiles; interior tiles stay on the fast path.
    @pl.when(boundary)
    def _():
        masked = sq
        if mask_rows:
            rid = i * block_rows + lax.broadcasted_iota(jnp.int32, (block_rows, 1), 0)
            masked = jnp.where(rid < rows, masked, jnp.float32(0.0))
        if mask_cols:
            cid = j * block_cols + lax.broadcasted_iota(jnp.int32, (1, block_cols), 1)
            masked = jnp.where(cid < cols, masked, jnp.float32(0.0))
        out_ref[...] = jnp.full((1, 1, 1), jnp.sum(masked), dtype=jnp.float32)

    @pl.when(jnp.logical_not(boundary))
    def _():
        out_ref[...] = jnp.full((1, 1, 1), jnp.sum(sq), dtype=jnp.float32)


@functools.partial(jax.jit,
                   static_argnames=("target_block_bytes", "vmem_limit_bytes"))
def _mse_pallas(pred2d, target2d, target_block_bytes=None, vmem_limit_bytes=None):
    """mean((pred2d - target2d)**2) over an unpadded [R, C] pair."""
    rows, cols = pred2d.shape
    if target_block_bytes is None or vmem_limit_bytes is None:
        blk, lim = _gen_params()
        target_block_bytes = target_block_bytes or blk
        vmem_limit_bytes = vmem_limit_bytes or lim

    # Budget in f32-equivalent bytes so the in-kernel f32 temporaries (cast,
    # sub, mul) stay inside the scoped-VMEM headroom even for bf16 inputs.
    itemsize = max(4, pred2d.dtype.itemsize, target2d.dtype.itemsize)
    block_rows, block_cols = _choose_blocks(rows, cols, itemsize, target_block_bytes)

    grid_r = _ceil_div(rows, block_rows)
    grid_c = _ceil_div(cols, block_cols)

    # v7x megacore: if everything landed in a single block but the array is
    # large, split one axis in two so both TensorCores stream (harmless on
    # single-TC v5e/v6e: one extra ~0.35us grid step on a >=2 MiB stream).
    if grid_r * grid_c == 1 and rows * cols * itemsize >= _MIN_SPLIT_BYTES:
        if rows >= 2 * _SUBLANE:
            block_rows = _round_up(_ceil_div(rows, 2), _SUBLANE)
            grid_r = _ceil_div(rows, block_rows)
        elif cols >= 2 * _LANE:
            block_cols = _round_up(_ceil_div(cols, 2), _LANE)
            grid_c = _ceil_div(cols, block_cols)

    mask_rows = (rows % block_rows) != 0
    mask_cols = (cols % block_cols) != 0
    num_partials = grid_r * grid_c

    kernel = functools.partial(
        _sse_partial_kernel,
        block_rows=block_rows, block_cols=block_cols,
        rows=rows, cols=cols, mask_rows=mask_rows, mask_cols=mask_cols)

    partials = pl.pallas_call(
        kernel,
        out_shape=jax.ShapeDtypeStruct((num_partials, 1, 1), jnp.float32),
        grid_spec=pltpu.PrefetchScalarGridSpec(
            num_scalar_prefetch=0,
            grid=(grid_r, grid_c),
            in_specs=[
                pl.BlockSpec((block_rows, block_cols), lambda i, j: (i, j)),
                pl.BlockSpec((block_rows, block_cols), lambda i, j: (i, j)),
            ],
            out_specs=pl.BlockSpec((1, 1, 1),
                                   lambda i, j: (i * grid_c + j, 0, 0)),
        ),
        compiler_params=pltpu.CompilerParams(
            # Every grid step writes its own partial -> fully independent.
            dimension_semantics=("parallel", "parallel"),
            vmem_limit_bytes=vmem_limit_bytes,
        ),
    )(pred2d, target2d)

    sse = jnp.sum(partials)                    # tiny (grid_r * grid_c) final reduce
    return sse / jnp.float32(pred2d.size)


def _reshape_for_mse(x):
    """MSE is shape-agnostic: pick a layout-friendly 2-D view of the elements."""
    n = x.size
    if n >= _LANE and n % _LANE == 0:
        return x.reshape(n // _LANE, _LANE)        # lane-dense, deep row tiles
    if n >= _SUBLANE and n % _SUBLANE == 0:
        return x.reshape(_SUBLANE, n // _SUBLANE)  # no sublane-padding waste
    return x.reshape(1, n)


# ----------------------------- Module wrapper -------------------------------
class SimpleMultiModalCriterion:
    """Pallas port of the PyTorch SimpleMultiModalCriterion (MSE w/ optional weight)."""

    def __init__(self, common_indices, common_weight: float = 1.2):
        self.common_indices = list(common_indices)
        self.common_weight = float(common_weight)
        print("SimpleMultiModalCriterion初始化:")
        print(f"  common_indices: {self.common_indices}")
        print(f"  common_weight: {self.common_weight}")

    def __call__(self, pred, target, channel_idx=None, is_common=None):
        pred = jnp.asarray(pred)        # keep native dtype (bf16 stays bf16)
        target = jnp.asarray(target)
        assert pred.shape == target.shape, "pred/target shape mismatch"

        p2 = _reshape_for_mse(pred)
        t2 = _reshape_for_mse(target)
        mse = _mse_pallas(p2, t2)

        # Host-side branch, matching the PyTorch signature (plain int / bool).
        # TODO(synk): if channel_idx / is_common ever arrive as traced arrays,
        # switch this to a jnp.where-based weighting.
        if is_common or (channel_idx is not None and channel_idx in self.common_indices):
            return self.common_weight * mse
        return mse


# ----------------------------------- main -----------------------------------
if __name__ == "__main__":
    key = jax.random.PRNGKey(0)
    k = jax.random.split(key, 10)

    crit = SimpleMultiModalCriterion(common_indices=[0, 2], common_weight=1.2)

    # Primary case matching the module's forward contract: [B, T] float32.
    B, T = 2, 100
    pred = jax.random.normal(k[0], (B, T), dtype=jnp.float32)
    target = jax.random.normal(k[1], (B, T), dtype=jnp.float32)
    loss_common = crit(pred, target, channel_idx=0)   # common channel -> weighted
    loss_plain = crit(pred, target, channel_idx=1)    # non-common -> plain MSE
    jax.block_until_ready(loss_common)
    jax.block_until_ready(loss_plain)
    ref = jnp.mean((pred - target) ** 2)
    assert jnp.allclose(loss_plain, ref, rtol=1e-5, atol=1e-6), (loss_plain, ref)
    assert jnp.allclose(loss_common, 1.2 * ref, rtol=1e-5, atol=1e-6), (loss_common, ref)

    # is_common flag path.
    loss_flag = crit(pred, target, is_common=True)
    jax.block_until_ready(loss_flag)
    assert jnp.allclose(loss_flag, 1.2 * ref, rtol=1e-5, atol=1e-6), (loss_flag, ref)

    # bf16 inputs, element count not divisible by 128 (8-row reshaped path).
    p_bf = jax.random.normal(k[2], (6, 2500), dtype=jnp.bfloat16)
    t_bf = jax.random.normal(k[3], (6, 2500), dtype=jnp.bfloat16)
    loss_bf = crit(p_bf, t_bf, channel_idx=5)
    jax.block_until_ready(loss_bf)
    ref_bf = jnp.mean((p_bf.astype(jnp.float32) - t_bf.astype(jnp.float32)) ** 2)
    assert jnp.allclose(loss_bf, ref_bf, rtol=1e-4, atol=1e-6), (loss_bf, ref_bf)

    # Multi-row-tile path with a ragged (masked) last row tile (small block budget).
    p_a = jax.random.normal(k[4], (520, 128), dtype=jnp.float32)
    t_a = jax.random.normal(k[5], (520, 128), dtype=jnp.float32)
    mse_a = _mse_pallas(p_a, t_a, target_block_bytes=64 * 1024)
    jax.block_until_ready(mse_a)
    ref_a = jnp.mean((p_a - t_a) ** 2)
    assert jnp.allclose(mse_a, ref_a, rtol=1e-4, atol=1e-6), (mse_a, ref_a)

    # Skinny-row column tiling with a ragged (masked) last column tile.
    p_b = jax.random.normal(k[6], (6, 3000), dtype=jnp.float32)
    t_b = jax.random.normal(k[7], (6, 3000), dtype=jnp.float32)
    mse_b = _mse_pallas(p_b, t_b, target_block_bytes=64 * 1024)
    jax.block_until_ready(mse_b)
    ref_b = jnp.mean((p_b - t_b) ** 2)
    assert jnp.allclose(mse_b, ref_b, rtol=1e-4, atol=1e-6), (mse_b, ref_b)

    # Single-block megacore split path (array >= 2 MiB fits one block budget).
    p_c = jax.random.normal(k[8], (1, 640 * 1024), dtype=jnp.float32)
    t_c = jax.random.normal(k[9], (1, 640 * 1024), dtype=jnp.float32)
    loss_c = crit(p_c, t_c, channel_idx=7)            # non-common -> plain MSE
    jax.block_until_ready(loss_c)
    ref_c = jnp.mean((p_c - t_c) ** 2)
    assert jnp.allclose(loss_c, ref_c, rtol=1e-4, atol=1e-6), (loss_c, ref_c)

    print("KERNEL_OK")
</pallas_src>

<mosaic_0001>
module attributes {stable_mosaic.version = 11 : i64} {
  func.func @_sse_partial_kernel(%arg0: i32, %arg1: i32, %arg2: memref<8x25xf32, #tpu.memory_space<vmem>>, %arg3: memref<8x25xf32, #tpu.memory_space<vmem>>, %arg4: memref<1x1x1xf32, #tpu.memory_space<vmem>>) attributes {dimension_semantics = [#tpu.dimension_semantics<parallel>, #tpu.dimension_semantics<parallel>], iteration_bounds = array<i64: 1, 1>, scalar_prefetch = 0 : i64, scratch_operands = 0 : i64, tpu.core_type = #tpu.core_type<tc>, window_params = [{transform_indices = @transform_0, window_bounds = array<i64: 8, 25>}, {transform_indices = @transform_1, window_bounds = array<i64: 8, 25>}, {transform_indices = @transform_2, window_bounds = array<i64: 1, 1, 1>}]} {
    %c0 = arith.constant 0 : index
    %c0_0 = arith.constant 0 : index
    %0 = vector.load %arg2[%c0, %c0_0] : memref<8x25xf32, #tpu.memory_space<vmem>>, vector<8x25xf32>
    %c0_1 = arith.constant 0 : index
    %c0_2 = arith.constant 0 : index
    %1 = vector.load %arg3[%c0_1, %c0_2] : memref<8x25xf32, #tpu.memory_space<vmem>>, vector<8x25xf32>
    %2 = arith.subf %0, %1 : vector<8x25xf32>
    %3 = arith.mulf %2, %2 : vector<8x25xf32>
    %4 = vector.shape_cast %3 : vector<8x25xf32> to vector<1x8x25xf32>
    %cst = arith.constant dense<0.000000e+00> : vector<1xf32>
    %5 = vector.multi_reduction <add>, %4, %cst [1, 2] : vector<1x8x25xf32> to vector<1xf32>
    %6 = vector.shape_cast %5 : vector<1xf32> to vector<1x1x1xf32>
    %7 = vector.extract %6[0, 0, 0] : f32 from vector<1x1x1xf32>
    %8 = vector.broadcast %7 : f32 to vector<1x1x1xf32>
    %c0_3 = arith.constant 0 : index
    %c0_4 = arith.constant 0 : index
    %c0_5 = arith.constant 0 : index
    %9 = vector.load %arg4[%c0_3, %c0_4, %c0_5] : memref<1x1x1xf32, #tpu.memory_space<vmem>>, vector<1x1x1xf32>
    tpu.vector_store %arg4[%c0_3, %c0_4, %c0_5], %8 {strides = array<i32>} : memref<1x1x1xf32, #tpu.memory_space<vmem>>, vector<1x1x1xf32>,
    return
  }
  func.func @transform_0(%arg0: i32, %arg1: i32) -> (i32, i32) {
    %c0_i32 = arith.constant 0 : i32
    return %arg0, %arg1 : i32, i32
  }
  func.func @transform_1(%arg0: i32, %arg1: i32) -> (i32, i32) {
    %c0_i32 = arith.constant 0 : i32
    return %arg0, %arg1 : i32, i32
  }
  func.func @transform_2(%arg0: i32, %arg1: i32) -> (i32, i32, i32) {
    %c1_i32 = arith.constant 1 : i32
    %0 = arith.muli %arg0, %c1_i32 : i32
    %1 = arith.addi %0, %arg1 : i32
    %c0_i32 = arith.constant 0 : i32
    %c0_i32_0 = arith.constant 0 : i32
    %c0_i32_1 = arith.constant 0 : i32
    return %1, %c0_i32, %c0_i32_0 : i32, i32, i32
  }
}

</mosaic_0001>

<bundles_post_ra>
// kernel: _mse_pallas.1
= control target key start
LH: loop header
LB: loop body
LE: loop exit
PB: predicated region body
PF: predicated region fallthrough
CT: control target
= control target key end

     0   :  { %7 = vsyncpa [#allocation3], 0  ;;  %s189_s0 = inlined_call_operand.hbm [shape: f32[8,25], index: 0, kind: input, shape index: {}]   ;;  %s190_s1 = inlined_call_operand.hbm [shape: f32[8,25], index: 1, kind: input, shape index: {}]   ;;  %s191_s2 = inlined_call_operand.hbm [shape: f32[1,1,1], index: 2, kind: output, shape index: {}]  }
   0x1   :  { %8 = vsyncpa [#allocation6], 0 }
   0x2   :  { %9 = vsyncpa [#allocation4], 0  ;;  %s15_s11 = sshll.u32 %s189_s0, 4  ;;  %s162_s12 = smov [#allocation2]   ;;  %s16_s11 = int_to_ptr.hbm [resolvable:$true] %s15_s11 }
   0x3   :  { %s17_s13 = sshll.u32 %s162_s12, 4  ;;  %s26_s16 = sshll.u32 %s190_s1, 4  ;;  %s18_s13 = int_to_ptr.vmem [resolvable:$true] %s17_s13  ;;  %s27_s16 = int_to_ptr.hbm [resolvable:$true] %s26_s16 }
   0x4   :  { %20 = dma.hbm_to_vmem [thread:$0]  %s16_s11, 128, %s18_s13, [#allocation3]  }
   0x5   :  { %s163_s17 = smov [#allocation5]  }
   0x6   :  { %s28_s18 = sshll.u32 %s163_s17, 4  ;;  %s29_s18 = int_to_ptr.vmem [resolvable:$true] %s28_s18 }
   0x7   :  { %31 = dma.hbm_to_vmem [thread:$0]  %s27_s16, 128, %s29_s18, [#allocation6]  }
   0x8   :  { %156 = dma.done.wait [#allocation3], 128  }
   0x9   :  { %157 = vsyncadd [#allocation3], 4294967168 }
   0xa   :  { %158 = dma.done.wait [#allocation6], 128  }
   0xb   :  { %159 = vsyncadd [#allocation6], 4294967168  ;;  %v41_v0 = vld [vmem:[#allocation2] sm:$0xff]  ;;  %v42_v1 = vld [vmem:[#allocation5] sm:$0xff]  ;;  %vm45_vm0 = vcmask 203776   ;;  %s164_s0 = smov [#allocation7]  }
   0xc   :  { %v43_v2 = vsub.f32 %v41_v0, %v42_v1  ;;  %s66_s1 = sshll.u32 %s164_s0, 4  ;;  %s68_s21 = sshll.u32 %s191_s2, 4  ;;  %vm57_vm1 = vcmask 0   ;;  %s67_s1 = int_to_ptr.vmem [resolvable:$true] %s66_s1  ;;  %s69_s21 = int_to_ptr.hbm [resolvable:$true] %s68_s21 }
   0xe   :  { %v44_v3 = vmul.f32 %v43_v2, %v43_v2 }
  0x10   :  { %v46_v4 = vsel %vm45_vm0, %v44_v3, 0.0 }
  0x11   :  { %47 = vadd.xlane.f32.xlu0 %v46_v4 }
  0x84   :  { %v48_v5 = vpop.xlane.xlu0 %47 }
  0x85   :  { %v49_v6 = vrot.slane %v48_v5, 4 }
  0x87   :  { %v50_v7 = vadd.f32 %v49_v6, %v48_v5 }
  0x89   :  { %v51_v8 = vrot.slane %v50_v7, 2 }
  0x8b   :  { %v52_v9 = vadd.f32 %v51_v8, %v50_v7 }
  0x8d   :  { %v53_v10 = vrot.slane %v52_v9, 1 }
  0x8f   :  { %v54_v11 = vadd.f32 %v53_v10, %v52_v9 }
  0x91   :  { %79 = vpush %v54_v11 }
  0xc2   :  { %s80_s22 = spop %79 }
  0xc3   :  { %v56_v12 = vstv %s80_s22 }
  0xc4   :  { %58 = vst.msk [vmem:[#allocation7] sm:$0x1] %vm57_vm1, %v56_v12 }
  0xc5   :  { %71 = dma.vmem_to_hbm [thread:$0]  %s67_s1, 16, %s69_s21, [#allocation4]  }
  0xc6   :  { %160 = dma.done.wait [#allocation4], 16  }
  0xc7   :  { %161 = vsyncadd [#allocation4], 4294967280 }
  0xc8   :  { %76 = vsyncpa [#allocation3], 1 }
  0xc9   :  { %77 = vsyncpa [#allocation6], 1 }
  0xca   :  { %78 = vsyncpa [#allocation4], 1 }

</bundles_post_ra>
